<compile_context>
chip_gen: v7x
topology: tpu7x:2x2x1
jax: 0.10.0
libtpu: 0.0.40
codegen_flags: <defaults>
</compile_context>

<pallas_src>
import jax
import jax.numpy as jnp
from jax import lax
from jax.experimental import pallas as pl
from jax.experimental.pallas import tpu as pltpu


def mlp_kernel(x_ref, w1_ref, b1_ref, w2_ref, b2_ref, w3_ref, b3_ref, o_ref):
    # x_ref: (TB, num_inputs) streamed f32 tile.
    # wN: torch-native (out, in) f32, bN: (out, 1) f32 -- all VMEM-resident.
    # Batch-on-lanes: every intermediate is (features, TB), so VPU work and the
    # final store are lane-dense (TB on the 128-lane axis).
    x = x_ref[...]                                                      # (TB, in)

    # Layer 1: contract over the shared feature axis of both operands (trans_b MXU
    # form) -> (30, TB); no explicit transpose of the streamed x tile is needed.
    h1 = lax.dot_general(w1_ref[...], x,
                         (((1,), (1,)), ((), ())),
                         preferred_element_type=jnp.float32) + b1_ref[...]
    h1 = jnp.maximum(h1, 0.0)

    # Layer 2: (20, 30) @ (30, TB) -> (20, TB)
    h2 = jnp.dot(w2_ref[...], h1, preferred_element_type=jnp.float32) + b2_ref[...]
    h2 = jnp.maximum(h2, 0.0)

    # Layer 3 (logits, no activation): (num_outputs, 20) @ (20, TB) -> (num_outputs, TB)
    logits = jnp.dot(w3_ref[...], h2, preferred_element_type=jnp.float32) + b3_ref[...]

    o_ref[...] = logits.astype(o_ref.dtype)


def _round_up(a, m):
    return (a + m - 1) // m * m


def _choose_tile(batch, block_batch):
    # Tiny batches: a single grid step with full-extent blocks (no alignment constraints
    # because block dims equal the full array dims).
    if batch <= 256:
        return batch
    # Large batches: lane-dense 128-multiple tiles, capped so there are >= 2 grid steps
    # (keeps both v7x TensorCores fed; harmless extra step on single-TC v5e/v6e).
    tb = min(block_batch, pl.cdiv(batch, 2))
    return _round_up(tb, 128)


def neural_network_forward(x, params, *, block_batch=8192):
    """params = (w1, b1, w2, b2, w3, b3); wN torch-native (out, in), bN (out, 1), all f32.

    Returns f32 logits of shape (batch, num_outputs).
    """
    w1, b1, w2, b2, w3, b3 = params
    batch, num_inputs = x.shape
    num_outputs = w3.shape[0]

    tb = _choose_tile(batch, block_batch)
    # Ragged last tile handled by Pallas boundary masking -> no jnp.pad pass over x.
    grid = (pl.cdiv(batch, tb),)

    def resident(arr):
        # Same block index every grid step -> DMA'd into VMEM once, resident thereafter.
        return pl.BlockSpec(arr.shape, lambda i: (0, 0))

    # Advisory cost for XLA's scheduler around the custom call.
    flops = 2 * batch * (w1.shape[0] * w1.shape[1]
                         + w2.shape[0] * w2.shape[1]
                         + w3.shape[0] * w3.shape[1])
    bytes_accessed = 4 * (x.size
                          + w1.size + b1.size + w2.size + b2.size + w3.size + b3.size
                          + batch * num_outputs)

    out_t = pl.pallas_call(
        mlp_kernel,
        out_shape=jax.ShapeDtypeStruct((num_outputs, batch), jnp.float32),
        grid=grid,
        in_specs=[
            pl.BlockSpec((tb, num_inputs), lambda i: (i, 0)),    # x: streamed, auto double-buffered
            resident(w1), resident(b1),
            resident(w2), resident(b2),
            resident(w3), resident(b3),
        ],
        # Batch on the lane axis -> unmasked, lane-dense stores.
        out_specs=pl.BlockSpec((num_outputs, tb), lambda i: (0, i)),
        compiler_params=pltpu.CompilerParams(
            dimension_semantics=(pltpu.PARALLEL,),
        ),
        cost_estimate=pl.CostEstimate(
            flops=flops, transcendentals=0, bytes_accessed=bytes_accessed),
    )(x, w1, b1, w2, b2, w3, b3)

    # Kernel emits (num_outputs, batch); present torch-style (batch, num_outputs).
    return out_t.T


def init_params(key, num_inputs, num_outputs):
    """Deterministic init mimicking torch.nn.Linear (uniform +/- 1/sqrt(fan_in)).

    Weights kept in torch's native (out, in) layout; biases stored as (out, 1) so they
    broadcast directly over the lane (batch) axis inside the kernel.
    """
    dims = [(num_inputs, 30), (30, 20), (20, num_outputs)]
    params = []
    for fan_in, fan_out in dims:
        kw, kb, key = jax.random.split(key, 3)
        bound = 1.0 / (fan_in ** 0.5)
        w = jax.random.uniform(kw, (fan_out, fan_in), jnp.float32, -bound, bound)
        b = jax.random.uniform(kb, (fan_out, 1), jnp.float32, -bound, bound)
        params.extend([w, b])
    return tuple(params)


def reference_forward(x, params):
    """Pure-JAX f32 reference (highest matmul precision ~= torch f32)."""
    w1, b1, w2, b2, w3, b3 = params
    h1 = jnp.maximum(jnp.dot(x, w1.T, precision="highest") + b1.T, 0.0)
    h2 = jnp.maximum(jnp.dot(h1, w2.T, precision="highest") + b2.T, 0.0)
    return jnp.dot(h2, w3.T, precision="highest") + b3.T


if __name__ == "__main__":
    num_inputs, num_outputs = 32, 4

    key = jax.random.PRNGKey(0)
    kx1, kx2, kp = jax.random.split(key, 3)
    params = init_params(kp, num_inputs, num_outputs)

    # Test 1: tiny batch -> single grid step with full-extent blocks.
    batch = 8
    x = jax.random.normal(kx1, (batch, num_inputs), dtype=jnp.float32)
    out = jax.block_until_ready(neural_network_forward(x, params))
    ref = reference_forward(x, params)
    assert out.shape == (batch, num_outputs)
    # Tolerance covers XLA-default vs Mosaic f32 matmul pass-count differences (~1e-3).
    assert jnp.allclose(out, ref, atol=5e-3, rtol=1e-3), "Pallas output mismatch (batch=8)"

    # Test 2: multi-step grid with a ragged last tile (batch=300 -> tb=256, 2 steps,
    # last block masked at the boundary).
    batch2 = 300
    x2 = jax.random.normal(kx2, (batch2, num_inputs), dtype=jnp.float32)
    out2 = jax.block_until_ready(neural_network_forward(x2, params))
    ref2 = reference_forward(x2, params)
    assert out2.shape == (batch2, num_outputs)
    assert jnp.allclose(out2, ref2, atol=5e-3, rtol=1e-3), "Pallas output mismatch (batch=300)"

    print("KERNEL_OK")
</pallas_src>

<mosaic_0001>
module attributes {stable_mosaic.version = 11 : i64} {
  func.func @mlp_kernel(%arg0: i32, %arg1: memref<8x32xf32, #tpu.memory_space<vmem>>, %arg2: memref<30x32xf32, #tpu.memory_space<vmem>>, %arg3: memref<30x1xf32, #tpu.memory_space<vmem>>, %arg4: memref<20x30xf32, #tpu.memory_space<vmem>>, %arg5: memref<20x1xf32, #tpu.memory_space<vmem>>, %arg6: memref<4x20xf32, #tpu.memory_space<vmem>>, %arg7: memref<4x1xf32, #tpu.memory_space<vmem>>, %arg8: memref<4x8xf32, #tpu.memory_space<vmem>>) attributes {dimension_semantics = [#tpu.dimension_semantics<parallel>], iteration_bounds = array<i64: 1>, scalar_prefetch = 0 : i64, scratch_operands = 0 : i64, tpu.core_type = #tpu.core_type<tc>, window_params = [{transform_indices = @transform_0, window_bounds = array<i64: 8, 32>}, {pipeline_mode = #tpu.pipeline_mode<synchronous>, transform_indices = @transform_1, window_bounds = array<i64: 30, 32>}, {pipeline_mode = #tpu.pipeline_mode<synchronous>, transform_indices = @transform_2, window_bounds = array<i64: 30, 1>}, {pipeline_mode = #tpu.pipeline_mode<synchronous>, transform_indices = @transform_3, window_bounds = array<i64: 20, 30>}, {pipeline_mode = #tpu.pipeline_mode<synchronous>, transform_indices = @transform_4, window_bounds = array<i64: 20, 1>}, {pipeline_mode = #tpu.pipeline_mode<synchronous>, transform_indices = @transform_5, window_bounds = array<i64: 4, 20>}, {pipeline_mode = #tpu.pipeline_mode<synchronous>, transform_indices = @transform_6, window_bounds = array<i64: 4, 1>}, {transform_indices = @transform_7, window_bounds = array<i64: 4, 8>}]} {
    %c0 = arith.constant 0 : index
    %c0_0 = arith.constant 0 : index
    %0 = vector.load %arg1[%c0, %c0_0] : memref<8x32xf32, #tpu.memory_space<vmem>>, vector<8x32xf32>
    %c0_1 = arith.constant 0 : index
    %c0_2 = arith.constant 0 : index
    %1 = vector.load %arg2[%c0_1, %c0_2] : memref<30x32xf32, #tpu.memory_space<vmem>>, vector<30x32xf32>
    %cst = arith.constant dense<0.000000e+00> : vector<30x8xf32>
    %2 = tpu.matmul %1, %0, %cst {dimension_numbers = #tpu.dot_dimension_numbers<[1], [1], [0], [0], [0, 0, 1, 0], [], []>} : vector<30x32xf32>, vector<8x32xf32>, vector<30x8xf32> -> vector<30x8xf32>
    %c0_3 = arith.constant 0 : index
    %c0_4 = arith.constant 0 : index
    %3 = vector.load %arg3[%c0_3, %c0_4] : memref<30x1xf32, #tpu.memory_space<vmem>>, vector<30x1xf32>
    %4 = vector.broadcast %3 : vector<30x1xf32> to vector<30x8xf32>
    %5 = arith.addf %2, %4 : vector<30x8xf32>
    %cst_5 = arith.constant 0.000000e+00 : f32
    %6 = vector.broadcast %cst_5 : f32 to vector<30x8xf32>
    %7 = arith.maximumf %5, %6 : vector<30x8xf32>
    %c0_6 = arith.constant 0 : index
    %c0_7 = arith.constant 0 : index
    %8 = vector.load %arg4[%c0_6, %c0_7] : memref<20x30xf32, #tpu.memory_space<vmem>>, vector<20x30xf32>
    %cst_8 = arith.constant dense<0.000000e+00> : vector<20x8xf32>
    %9 = tpu.matmul %8, %7, %cst_8 {dimension_numbers = #tpu.dot_dimension_numbers<[1], [0], [0], [1], [0, 0, 1, 1], [], []>} : vector<20x30xf32>, vector<30x8xf32>, vector<20x8xf32> -> vector<20x8xf32>
    %c0_9 = arith.constant 0 : index
    %c0_10 = arith.constant 0 : index
    %10 = vector.load %arg5[%c0_9, %c0_10] : memref<20x1xf32, #tpu.memory_space<vmem>>, vector<20x1xf32>
    %11 = vector.broadcast %10 : vector<20x1xf32> to vector<20x8xf32>
    %12 = arith.addf %9, %11 : vector<20x8xf32>
    %cst_11 = arith.constant 0.000000e+00 : f32
    %13 = vector.broadcast %cst_11 : f32 to vector<20x8xf32>
    %14 = arith.maximumf %12, %13 : vector<20x8xf32>
    %c0_12 = arith.constant 0 : index
    %c0_13 = arith.constant 0 : index
    %15 = vector.load %arg6[%c0_12, %c0_13] : memref<4x20xf32, #tpu.memory_space<vmem>>, vector<4x20xf32>
    %cst_14 = arith.constant dense<0.000000e+00> : vector<4x8xf32>
    %16 = tpu.matmul %15, %14, %cst_14 {dimension_numbers = #tpu.dot_dimension_numbers<[1], [0], [0], [1], [0, 0, 1, 1], [], []>} : vector<4x20xf32>, vector<20x8xf32>, vector<4x8xf32> -> vector<4x8xf32>
    %c0_15 = arith.constant 0 : index
    %c0_16 = arith.constant 0 : index
    %17 = vector.load %arg7[%c0_15, %c0_16] : memref<4x1xf32, #tpu.memory_space<vmem>>, vector<4x1xf32>
    %18 = vector.broadcast %17 : vector<4x1xf32> to vector<4x8xf32>
    %19 = arith.addf %16, %18 : vector<4x8xf32>
    %c0_17 = arith.constant 0 : index
    %c0_18 = arith.constant 0 : index
    %20 = vector.load %arg8[%c0_17, %c0_18] : memref<4x8xf32, #tpu.memory_space<vmem>>, vector<4x8xf32>
    tpu.vector_store %arg8[%c0_17, %c0_18], %19 {strides = array<i32>} : memref<4x8xf32, #tpu.memory_space<vmem>>, vector<4x8xf32>,
    return
  }
  func.func @transform_0(%arg0: i32) -> (i32, i32) {
    %c0_i32 = arith.constant 0 : i32
    %c0_i32_0 = arith.constant 0 : i32
    return %arg0, %c0_i32 : i32, i32
  }
  func.func @transform_1(%arg0: i32) -> (i32, i32) {
    %c0_i32 = arith.constant 0 : i32
    %c0_i32_0 = arith.constant 0 : i32
    %c0_i32_1 = arith.constant 0 : i32
    return %c0_i32, %c0_i32_0 : i32, i32
  }
  func.func @transform_2(%arg0: i32) -> (i32, i32) {
    %c0_i32 = arith.constant 0 : i32
    %c0_i32_0 = arith.constant 0 : i32
    %c0_i32_1 = arith.constant 0 : i32
    return %c0_i32, %c0_i32_0 : i32, i32
  }
  func.func @transform_3(%arg0: i32) -> (i32, i32) {
    %c0_i32 = arith.constant 0 : i32
    %c0_i32_0 = arith.constant 0 : i32
    %c0_i32_1 = arith.constant 0 : i32
    return %c0_i32, %c0_i32_0 : i32, i32
  }
  func.func @transform_4(%arg0: i32) -> (i32, i32) {
    %c0_i32 = arith.constant 0 : i32
    %c0_i32_0 = arith.constant 0 : i32
    %c0_i32_1 = arith.constant 0 : i32
    return %c0_i32, %c0_i32_0 : i32, i32
  }
  func.func @transform_5(%arg0: i32) -> (i32, i32) {
    %c0_i32 = arith.constant 0 : i32
    %c0_i32_0 = arith.constant 0 : i32
    %c0_i32_1 = arith.constant 0 : i32
    return %c0_i32, %c0_i32_0 : i32, i32
  }
  func.func @transform_6(%arg0: i32) -> (i32, i32) {
    %c0_i32 = arith.constant 0 : i32
    %c0_i32_0 = arith.constant 0 : i32
    %c0_i32_1 = arith.constant 0 : i32
    return %c0_i32, %c0_i32_0 : i32, i32
  }
  func.func @transform_7(%arg0: i32) -> (i32, i32) {
    %c0_i32 = arith.constant 0 : i32
    %c0_i32_0 = arith.constant 0 : i32
    return %c0_i32, %arg0 : i32, i32
  }
}

</mosaic_0001>

<bundles_post_ra>
// kernel: tpu_custom_call.1
= control target key start
LH: loop header
LB: loop body
LE: loop exit
PB: predicated region body
PF: predicated region fallthrough
CT: control target
= control target key end

     0   :  { %12 = vsyncpa [#allocation3], 0  ;;  %s650_s0 = inlined_call_operand.hbm [shape: f32[8,32], index: 0, kind: input, shape index: {}]   ;;  %s651_s1 = inlined_call_operand.vmem [shape: f32[30,32], index: 1, kind: input, shape index: {}]   ;;  %s652_s2 = inlined_call_operand.vmem [shape: f32[30,1], index: 2, kind: input, shape index: {}]   ;;  %s653_s3 = inlined_call_operand.vmem [shape: f32[20,30], index: 3, kind: input, shape index: {}]   ;;  %s654_s4 = inlined_call_operand.vmem [shape: f32[20,1], index: 4, kind: input, shape index: {}]   ;;  %s655_s5 = inlined_call_operand.vmem [shape: f32[4,20], index: 5, kind: input, shape index: {}]   ;;  %s656_s6 = inlined_call_operand.vmem [shape: f32[4,1], index: 6, kind: input, shape index: {}]   ;;  %s657_s7 = inlined_call_operand.hbm [shape: f32[4,8], index: 7, kind: output, shape index: {}]  }
   0x1   :  { %13 = vsyncpa [#allocation4], 0  ;;  %s521_s24 = smov [#allocation2]   ;;  %s473_s28 = scalar_lea.hbm %s650_s0, 128 }
   0x2   :  { %s20_s25 = sshll.u32 %s521_s24, 4  ;;  %p474_p0 = scmp.ne.s32.totalorder %s650_s0, %s473_s28  ;;  %s21_s25 = int_to_ptr.vmem [resolvable:$true] %s20_s25 }
   0x3   :  { %p477_p1 = scmp.lt.u32.totalorder %s473_s28, %s650_s0 }
   0x5   :  { %p479_p2 = pnand %p477_p1, %p474_p0 }
   0x7   :  { %482 = shalt.err (!%p479_p2)
}
   0x8   :  { %s483_s10 = scalar_lea.vmem %s21_s25, 128  ;;  %p488_p4 = scmp.lt.s32.totalorder %s21_s25, %s21_s25 }
   0x9   :  { %p484_p3 = scmp.ne.s32.totalorder %s21_s25, %s483_s10  ;;  %p489_p5 = scmp.lt.s32.totalorder %s483_s10, %s483_s10 }
   0xb   :  { %p490_p6 = por %p489_p5, %p488_p4 }
   0xd   :  { %p491_p7 = pnand %p490_p6, %p484_p3 }
   0xf   :  { %494 = shalt.err (!%p491_p7)
}
  0x10   :  { %23 = dma.hbm_to_vmem [thread:$0]  %s650_s0, 128, %s21_s25, [#allocation3]  }
  0x11   :  { %517 = dma.done.wait [#allocation3], 128  }
  0x12   :  { %518 = vsyncadd [#allocation3], 4294967168  ;;  %v522_v0 = vmov 0   ;;  %vm68_vm0 = vcmask 261120   ;;  %v39_v1 = vld [vmem:[#allocation2] sm:$0xff]  ;;  %v41_v4 = vld [vmem:[%s651_s1 + $0x8] sm:$0xff] }
  0x13   :  { %471 = vset.pattern.permute.xlu0 %v522_v0  ;;  %472 = vset.pattern.permute.xlu1 %v522_v0  ;;  %v40_v2 = vld [vmem:[%s651_s1] sm:$0xff]  ;;  %v46_v5 = vld [vmem:[%s652_s2 + $0x10] sm:$0xff]  ;;  %v45_v7 = vld [vmem:[%s652_s2 + $0x8] sm:$0xff]  ;;  %v523_v14 = vmov 0.0|0.0   ;;  %vm524_vm1 = vmmov 0   ;;  %v525_v15 = vmov 0.0  }
  0x14   :  { %420 = vmatprep.subr.msk.mxu0 %vm68_vm0, %v39_v1  ;;  %422 = vmatprep.mubr.msk.f32.mxu0 %vm68_vm0, %v40_v2  ;;  %v44_v3 = vld [vmem:[%s652_s2] sm:$0xff]  ;;  %v42_v6 = vld [vmem:[%s651_s1 + $0x10] sm:$0xff]  ;;  %v47_v8 = vld [vmem:[%s652_s2 + $0x18] sm:$0x3f]  ;;  %vm204_vm2 = vcmask 1045504   ;;  %vm526_vm3 = vmmov 1  }
  0x15   :  { %421 = vmatpush3.xpose.msk.msra.mxu0 %vm68_vm0, %v39_v1  ;;  %50 = vperm.xlu0 %471, %v44_v3   ;;  %v43_v9 = vld [vmem:[%s651_s1 + $0x18] sm:$0x3f]  ;;  %v176_v10 = vld [vmem:[%s654_s4] sm:$0xff]  ;;  %v177_v11 = vld [vmem:[%s654_s4 + $0x8] sm:$0xff]  ;;  %vm194_vm5 = vcmask 244736   ;;  %vm302_vm6 = vcmask 1043456  }
  0x16   :  { %60 = vperm.xlu1 %472, %v46_v5   ;;  %v178_v12 = vld [vmem:[%s654_s4 + $0x10] sm:$0xf]  ;;  %v292_v13 = vld [vmem:[%s656_s6] sm:$0xf]  ;;  %454 = vmatprep.subr.bf16.mxu1 %v523_v14  ;;  %vm459_vm4 = vmpackc.low %vm204_vm2, %vm526_vm3  ;;  %vm298_vm7 = vcmask 162816   ;;  %s527_s16 = smov [#allocation5]  }
  0x17   :  { %461 = vmatprep.subr.bf16.mxu0 %v523_v14  ;;  %436 = vmatprep.mubr.msk.f32.mxu1 %vm524_vm1, %v525_v15  ;;  %v173_v34 = vld [vmem:[%s653_s3] sm:$0xff]  ;;  %v174_v35 = vld [vmem:[%s653_s3 + $0x8] sm:$0xff]  ;;  %v175_v36 = vld [vmem:[%s653_s3 + $0x10] sm:$0xf]  ;;  %s384_s0 = sshll.u32 %s527_s16, 4  ;;  %vm376_vm8 = vcmask 60416   ;;  %s385_s0 = int_to_ptr.vmem [resolvable:$true] %s384_s0 }
  0x18   :  { %423 = vmatmul.mubr.msk.f32.vlgmr.msra.gmra.mrb[0].mxu0 %vm68_vm0, %v41_v4  ;;  %v291_v53 = vld [vmem:[%s655_s5] sm:$0xf]  ;;  %s495_s17 = scalar_lea.vmem %s385_s0, 64  ;;  %p500_p9 = scmp.lt.s32.totalorder %s385_s0, %s385_s0 }
  0x19   :  { %425 = vmatprep.mubr.msk.f32.mxu0 %vm68_vm0, %v42_v6  ;;  %55 = vperm.xlu0 %471, %v45_v7   ;;  %p496_p8 = scmp.ne.s32.totalorder %s385_s0, %s495_s17  ;;  %p501_p10 = scmp.lt.s32.totalorder %s495_s17, %s495_s17 }
  0x1a   :  { %65 = vperm.xlu1 %472, %v47_v8  }
  0x1b   :  { %p502_p11 = por %p501_p10, %p500_p9 }
  0x1c   :  { %426 = vmatmul.mubr.msk.f32.gmra.mrb[2].mxu0 %vm68_vm0, %v43_v9 }
  0x1d   :  { %181 = vperm.xlu0 %471, %v176_v10   ;;  %451 = vmatprep.mubr.msk.f32.mxu0 %vm524_vm1, %v525_v15  ;;  %p503_p12 = pnand %p502_p11, %p496_p8 }
  0x1e   :  { %186 = vperm.xlu1 %472, %v177_v11  }
  0x21   :  { %191 = vperm.xlu0 %471, %v178_v12  }
  0x22   :  { %295 = vperm.xlu1 %472, %v292_v13  }
  0x94   :  { %v51_v16 = vpop.permute.xlu0 %50 }
  0x95   :  { %v61_v17 = vpop.permute.xlu1 %60 }
  0x98   :  { %v56_v18 = vpop.permute.xlu0 %55 }
  0x99   :  { %v66_v24 = vpop.permute.xlu1 %65 }
  0x9c   :  { %v182_v39 = vpop.permute.xlu0 %181 }
  0x9d   :  { %v187_v41 = vpop.permute.xlu1 %186 }
  0xa0   :  { %v192_v47 = vpop.permute.xlu0 %191 }
  0xa1   :  { %v296_v54 = vpop.permute.xlu1 %295 }
  0xeb   :  { %v424_v19 = vpop.f32.mrb[0].mxu0 }
  0xec   :  { %v156_v20 = vadd.f32 %v424_v19, %v56_v18  ;;  %v150_v21 = vpop.f32.mrb[1].mxu0 }
  0xed   :  { %v151_v22 = vadd.f32 %v150_v21, %v51_v16 }
  0xee   :  { %v170_v23 = vmax.f32 %v156_v20, 0.0 }
  0xef   :  { %v169_v25 = vmax.f32 %v151_v22, 0.0  ;;  %v427_v26 = vpop.f32.mrb[2].mxu0 }
  0xf0   :  { %v166_v27 = vadd.f32 %v427_v26, %v66_v24  ;;  %v160_v28 = vpop.f32.mrb[3].mxu0 }
  0xf1   :  { %v161_v29 = vadd.f32 %v160_v28, %v61_v17  ;;  %v455_v30 = vpack.c.bf16 %v170_v23, %v169_v25 }
  0xf2   :  { %v172_v31 = vmax.f32 %v166_v27, 0.0 }
  0xf3   :  { %v171_v32 = vmax.f32 %v161_v29, 0.0  ;;  %456 = vmatpush3.bf16.msra.mxu1 %v455_v30 }
  0xf4   :  { %457 = vmatprep.subr.bf16.mxu1 %v523_v14 }
  0xf5   :  { %v458_v33 = vpack.c.bf16 %v172_v31, %v171_v32 }
  0xf7   :  { %460 = vmatpush3.bf16.msk.msra.mxu1 %vm459_vm4, %v458_v33 }
  0xfa   :  { %437 = vmatmul.mubr.msk.f32.vlgmr.msra.gmra.mrb[0].mxu1 %vm194_vm5, %v173_v34 }
  0xfb   :  { %439 = vmatprep.mubr.msk.f32.mxu1 %vm524_vm1, %v525_v15 }
  0xfe   :  { %440 = vmatmul.mubr.msk.f32.gmra.mrb[2].mxu1 %vm194_vm5, %v174_v35 }
  0xff   :  { %442 = vmatprep.mubr.msk.f32.mxu1 %vm524_vm1, %v525_v15 }
 0x102   :  { %443 = vmatmul.mubr.msk.f32.gmra.mrb[4].mxu1 %vm194_vm5, %v175_v36 }
 0x1cd   :  { %v274_v37 = vpop.f32.mrb[0].mxu1 }
 0x1ce   :  { %v438_v38 = vpop.f32.mrb[1].mxu1  ;;  %v275_v40 = vadd.f32 %v274_v37, %v182_v39 }
 0x1d0   :  { %v288_v45 = vmax.f32 %v275_v40, 0.0 }
 0x1d1   :  { %v279_v42 = vpop.f32.mrb[2].mxu1 }
 0x1d2   :  { %v280_v43 = vadd.f32 %v279_v42, %v187_v41  ;;  %v441_v44 = vpop.f32.mrb[3].mxu1 }
 0x1d4   :  { %v289_v46 = vmax.f32 %v280_v43, 0.0 }
 0x1d5   :  { %v284_v48 = vpop.f32.mrb[4].mxu1 }
 0x1d6   :  { %v462_v49 = vpack.c.bf16 %v289_v46, %v288_v45  ;;  %v285_v50 = vadd.f32 %v284_v48, %v192_v47  ;;  %v444_v51 = vpop.f32.mrb[5].mxu1 }
 0x1d8   :  { %463 = vmatpush3.bf16.msra.mxu0 %v462_v49  ;;  %v290_v52 = vmax.f32 %v285_v50, 0.0 }
 0x1d9   :  { %449 = vmatprep.subr.mxu0 %v525_v15 }
 0x1dc   :  { %450 = vmatpush3.msk.msra.mxu0 %vm302_vm6, %v290_v52 }
 0x1dd   :  { %452 = vmatmul.mubr.msk.f32.vlgmr.msra.gmra.mrb[4].mxu0 %vm298_vm7, %v291_v53 }
 0x2b0   :  { %v372_v55 = vpop.f32.mrb[4].mxu0 }
 0x2b1   :  { %v373_v56 = vadd.f32 %v372_v55, %v296_v54  ;;  %v453_v57 = vpop.f32.mrb[5].mxu0 }
 0x2b3   :  { %377 = vst.msk [vmem:[#allocation5] sm:$0xf] %vm376_vm8, %v373_v56 }
 0x2b4   :  { %506 = shalt.err (!%p503_p12)
}
 0x2b5   :  { %s507_s19 = scalar_lea.hbm %s657_s7, 64 }
 0x2b6   :  { %p508_p13 = scmp.ne.s32.totalorder %s657_s7, %s507_s19  ;;  %p511_p0 = scmp.lt.u32.totalorder %s507_s19, %s657_s7 }
 0x2b8   :  { %p513_p1 = pnand %p511_p0, %p508_p13 }
 0x2ba   :  { %516 = shalt.err (!%p513_p1)
}
 0x2bb   :  { %387 = dma.vmem_to_hbm [thread:$0]  %s385_s0, 64, %s657_s7, [#allocation4]  }
 0x2bc   :  { %519 = dma.done.wait [#allocation4], 64  }
 0x2bd   :  { %520 = vsyncadd [#allocation4], 4294967232 }
 0x2be   :  { %391 = vsyncpa [#allocation3], 1 }
 0x2bf   :  { %392 = vsyncpa [#allocation4], 1 }

</bundles_post_ra>
